<compile_context>
chip_gen: v6e
topology: v6e:2x2x1
jax: 0.10.0
libtpu: 0.0.40
codegen_flags: <defaults>
</compile_context>

<pallas_src>
import functools

import jax
import jax.numpy as jnp
from jax import lax
from jax.experimental import pallas as pl
from jax.experimental.pallas import tpu as pltpu

_LANE = 128
_SUBLANE = 8
_MAX_TB = 2048          # keeps the per-step 8-row fold short (<= 256 groups)
_FALLBACK_ELEMS = 65536  # below this, a fused XLA reduction beats a pallas_call


def _round_up(x, m):
    return ((x + m - 1) // m) * m


def _vmem_limit_bytes():
    """Scoped-VMEM limit: 64 MiB on v5e/v6e (128 MiB physical), 48 MiB on v7x
    (64 MiB physical).  Conservative fallback if the query is unavailable."""
    try:
        cap = int(pltpu.get_tpu_info().vmem_capacity_bytes)
    except Exception:  # pragma: no cover - conservative default (v7x-sized)
        cap = 64 * 1024 * 1024
    return min((cap * 3) // 4, 64 * 1024 * 1024)


def _choose_tiles(b, feat, itemsize, budget_bytes):
    """Pick (tb, tf): batch-tile rows (multiple of 8) and feature-tile width.

    Prefers keeping the whole feature axis in one full-extent block (no lane
    padding, no host copies); only splits the feature axis (lane-aligned tiles)
    when a single 8-row block would not fit the per-tile VMEM budget.
    The budget accounts for the lane-padded VMEM footprint of narrow features.
    """
    b8 = _round_up(max(b, 1), _SUBLANE)
    row_bytes = _round_up(max(feat, 1), _LANE) * itemsize  # VMEM bytes per row
    tb = (budget_bytes // row_bytes) // _SUBLANE * _SUBLANE
    if tb >= _SUBLANE:
        return min(tb, _MAX_TB, b8), feat, 1
    # Feature axis too wide for a single block: lane-aligned feature tiles.
    tf = (budget_bytes // (_SUBLANE * itemsize)) // _LANE * _LANE
    tf = max(_LANE, min(tf, _round_up(feat, _LANE)))
    nf = pl.cdiv(feat, tf)
    return _SUBLANE, tf, nf


def _sq_colsum_kernel(o_ref, x_ref, colsum_ref, acc_ref, *, batch, tb):
    """Accumulate per-feature sums of (o - x)^2 over the batch axis.

    Grid = (feature blocks [parallel], batch blocks [arbitrary]).
    acc_ref: (8, tf) f32 resident scratch; colsum_ref: (1, tf) output block.
    """
    bi = pl.program_id(1)
    nb = pl.num_programs(1)

    @pl.when(bi == 0)
    def _init():
        acc_ref[...] = jnp.zeros_like(acc_ref)

    # Per-step work is VALU-only and hides under the streaming input DMA.
    d = o_ref[...].astype(jnp.float32) - x_ref[...].astype(jnp.float32)
    sq = d * d

    if batch % tb != 0:
        # Ragged last batch tile: Pallas does not zero-fill OOB rows, so mask
        # them (one compare+select per vreg; all-true on non-last steps).
        row = lax.broadcasted_iota(jnp.int32, sq.shape, 0)
        sq = jnp.where(row < (batch - bi * tb), sq, 0.0)

    # Fold groups of 8 rows into the small (8, tf) accumulator: layout-
    # preserving sublane-split reshape + leading-axis reduce -> pure vreg adds
    # (no XLU), and tb/8x less accumulator read-modify-write traffic per step.
    if tb == _SUBLANE:
        acc_ref[...] += sq
    else:
        acc_ref[...] += jnp.sum(
            sq.reshape(tb // _SUBLANE, _SUBLANE, sq.shape[-1]), axis=0)

    @pl.when(bi == nb - 1)
    def _finalize():
        # Single cross-sublane (XLU) reduction per feature block.
        colsum_ref[...] = jnp.sum(acc_ref[...], axis=0, keepdims=True)


def _custom_loss_pallas(o2, x2, alpha, b, feat, tile_budget_bytes=None):
    itemsize = jnp.dtype(o2.dtype).itemsize
    vmem_limit = _vmem_limit_bytes()
    if tile_budget_bytes is None:
        # 2 inputs x 2 pipeline buffers per tile + small acc => ~2/3 of limit.
        tile_budget_bytes = vmem_limit // 6
    tb, tf, nf = _choose_tiles(b, feat, itemsize, tile_budget_bytes)
    nb = pl.cdiv(b, tb)

    kernel = functools.partial(_sq_colsum_kernel, batch=int(b), tb=int(tb))

    colsum = pl.pallas_call(
        kernel,
        out_shape=jax.ShapeDtypeStruct((1, nf * tf), jnp.float32),
        grid_spec=pltpu.PrefetchScalarGridSpec(
            num_scalar_prefetch=0,
            grid=(nf, nb),
            in_specs=[
                pl.BlockSpec((tb, tf), lambda fi, bi: (bi, fi)),
                pl.BlockSpec((tb, tf), lambda fi, bi: (bi, fi)),
            ],
            out_specs=pl.BlockSpec((1, tf), lambda fi, bi: (0, fi)),
            scratch_shapes=[pltpu.VMEM((_SUBLANE, tf), jnp.float32)],
        ),
        compiler_params=pltpu.CompilerParams(
            # Feature axis is independent ("parallel": v7x can split it across
            # its two TensorCores); batch axis carries the resident accumulator.
            dimension_semantics=("parallel", "arbitrary"),
            vmem_limit_bytes=vmem_limit,
        ),
        cost_estimate=pl.CostEstimate(
            flops=3 * b * feat,
            transcendentals=0,
            bytes_accessed=2 * b * feat * itemsize + 4 * nf * tf,
        ),
    )(o2, x2)

    # Tiny JAX epilogue on a (feat,) vector -- fuses into the surrounding graph.
    # (Garbage columns from a ragged last feature block are sliced away here.)
    col_sq_sum = colsum[0, :feat]
    mse = jnp.abs(col_sq_sum * (1.0 / b))
    mean_mse = jnp.mean(mse)
    # feat == 1 -> NaN, matching torch.std (unbiased) on a single element.
    std = jnp.std(mse, ddof=1)
    return mean_mse + alpha * std


def _reference(outputs, inputs, alpha=0.5):
    """Plain-jnp CustomLoss (also the fused-XLA fallback for tiny shapes)."""
    o = outputs.astype(jnp.float32)
    x = inputs.astype(jnp.float32)
    mse = jnp.abs(jnp.mean((o - x) ** 2, axis=0)).reshape(-1)
    return jnp.mean(mse) + alpha * jnp.std(mse, ddof=1)


def custom_loss(outputs, inputs, alpha=0.5, use_pallas=None, tile_budget_bytes=None):
    """Pallas implementation of CustomLoss.forward. Returns a scalar f32."""
    assert outputs.shape == inputs.shape, (outputs.shape, inputs.shape)
    b = outputs.shape[0]
    feat = 1
    for d in outputs.shape[1:]:
        feat *= d
    if use_pallas is None:
        # Tiny problems are launch-overhead-bound; let XLA fuse them instead.
        use_pallas = (b * feat) >= _FALLBACK_ELEMS
    if not use_pallas:
        return _reference(outputs, inputs, alpha)
    # Flatten trailing dims (mean/std over all remaining elements is identical);
    # keep the NATIVE dtype so the DMA moves the minimum number of bytes.
    o2 = outputs.reshape(b, feat)
    x2 = inputs.reshape(b, feat)
    return _custom_loss_pallas(o2, x2, float(alpha), b, feat, tile_budget_bytes)


if __name__ == "__main__":
    key = jax.random.PRNGKey(0)
    ks = jax.random.split(key, 8)

    # 1) Module-scale shape (batch=8, hidden=32): force the Pallas kernel once.
    o_s = jax.random.normal(ks[0], (8, 32), dtype=jnp.float32)
    x_s = jax.random.normal(ks[1], (8, 32), dtype=jnp.float32)
    loss_s = jax.block_until_ready(custom_loss(o_s, x_s, alpha=0.5, use_pallas=True))
    ref_s = _reference(o_s, x_s, alpha=0.5)
    assert jnp.allclose(loss_s, ref_s, rtol=1e-5, atol=1e-6), (loss_s, ref_s)

    # 2) Same shape through the auto path -> fused-XLA fallback (size guard).
    loss_f = jax.block_until_ready(custom_loss(o_s, x_s, alpha=0.5))
    assert jnp.allclose(loss_f, ref_s, rtol=1e-5, atol=1e-6), (loss_f, ref_s)

    # 3) Larger unaligned f32 shape: multi-step batch grid + ragged last tile
    #    (5000 % 2048 != 0) -> exercises the in-kernel row mask and pipelining.
    o_l = jax.random.normal(ks[2], (5000, 200), dtype=jnp.float32)
    x_l = jax.random.normal(ks[3], (5000, 200), dtype=jnp.float32)
    loss_l = jax.block_until_ready(custom_loss(o_l, x_l, alpha=0.5))
    ref_l = _reference(o_l, x_l, alpha=0.5)
    assert jnp.allclose(loss_l, ref_l, rtol=1e-4, atol=1e-6), (loss_l, ref_l)

    # 4) Tiny tile budget forces the feature-axis split (nf > 1, ragged feature
    #    block, "parallel" axis > 1) plus a ragged batch tile (300 % 8 != 0).
    o_w = jax.random.normal(ks[4], (300, 1000), dtype=jnp.float32)
    x_w = jax.random.normal(ks[5], (300, 1000), dtype=jnp.float32)
    loss_w = jax.block_until_ready(
        custom_loss(o_w, x_w, alpha=0.5, use_pallas=True, tile_budget_bytes=16 * 1024))
    ref_w = _reference(o_w, x_w, alpha=0.5)
    assert jnp.allclose(loss_w, ref_w, rtol=1e-4, atol=1e-6), (loss_w, ref_w)

    # 5) bf16 inputs stay bf16 through the DMA; f32 math happens in-kernel.
    o_b = jax.random.normal(ks[6], (64, 96), dtype=jnp.bfloat16)
    x_b = jax.random.normal(ks[7], (64, 96), dtype=jnp.bfloat16)
    loss_b = jax.block_until_ready(custom_loss(o_b, x_b, alpha=0.5, use_pallas=True))
    ref_b = _reference(o_b, x_b, alpha=0.5)
    assert jnp.allclose(loss_b, ref_b, rtol=1e-4, atol=1e-6), (loss_b, ref_b)

    print("KERNEL_OK")
</pallas_src>

<mosaic_0001>
module attributes {stable_mosaic.version = 11 : i64} {
  func.func @_sq_colsum_kernel(%arg0: i32, %arg1: i32, %arg2: memref<8x32xf32, #tpu.memory_space<vmem>>, %arg3: memref<8x32xf32, #tpu.memory_space<vmem>>, %arg4: memref<1x32xf32, #tpu.memory_space<vmem>>, %arg5: memref<8x32xf32, #tpu.memory_space<vmem>>) attributes {dimension_semantics = [#tpu.dimension_semantics<parallel>, #tpu.dimension_semantics<arbitrary>], iteration_bounds = array<i64: 1, 1>, scalar_prefetch = 0 : i64, scratch_operands = 1 : i64, tpu.core_type = #tpu.core_type<tc>, window_params = [{transform_indices = @transform_0, window_bounds = array<i64: 8, 32>}, {transform_indices = @transform_1, window_bounds = array<i64: 8, 32>}, {transform_indices = @transform_2, window_bounds = array<i64: 1, 32>}]} {
    %c0_i32 = arith.constant 0 : i32
    %0 = arith.cmpi eq, %arg1, %c0_i32 : i32
    %1 = arith.extui %0 : i1 to i32
    %c0_i32_0 = arith.constant 0 : i32
    %2 = arith.cmpi ne, %1, %c0_i32_0 : i32
    scf.if %2 {
      %cst = arith.constant 0.000000e+00 : f32
      %13 = vector.broadcast %cst : f32 to vector<8x32xf32>
      %c0_10 = arith.constant 0 : index
      %c0_11 = arith.constant 0 : index
      %14 = vector.load %arg5[%c0_10, %c0_11] : memref<8x32xf32, #tpu.memory_space<vmem>>, vector<8x32xf32>
      tpu.vector_store %arg5[%c0_10, %c0_11], %13 {strides = array<i32>} : memref<8x32xf32, #tpu.memory_space<vmem>>, vector<8x32xf32>,
    } else {
    }
    %c0 = arith.constant 0 : index
    %c0_1 = arith.constant 0 : index
    %3 = vector.load %arg2[%c0, %c0_1] : memref<8x32xf32, #tpu.memory_space<vmem>>, vector<8x32xf32>
    %c0_2 = arith.constant 0 : index
    %c0_3 = arith.constant 0 : index
    %4 = vector.load %arg3[%c0_2, %c0_3] : memref<8x32xf32, #tpu.memory_space<vmem>>, vector<8x32xf32>
    %5 = arith.subf %3, %4 : vector<8x32xf32>
    %6 = arith.mulf %5, %5 : vector<8x32xf32>
    %c0_4 = arith.constant 0 : index
    %c0_5 = arith.constant 0 : index
    %7 = vector.load %arg5[%c0_4, %c0_5] : memref<8x32xf32, #tpu.memory_space<vmem>>, vector<8x32xf32>
    %8 = arith.addf %7, %6 : vector<8x32xf32>
    %c0_6 = arith.constant 0 : index
    %c0_7 = arith.constant 0 : index
    %9 = vector.load %arg5[%c0_6, %c0_7] : memref<8x32xf32, #tpu.memory_space<vmem>>, vector<8x32xf32>
    tpu.vector_store %arg5[%c0_6, %c0_7], %8 {strides = array<i32>} : memref<8x32xf32, #tpu.memory_space<vmem>>, vector<8x32xf32>,
    %c0_i32_8 = arith.constant 0 : i32
    %10 = arith.cmpi eq, %arg1, %c0_i32_8 : i32
    %11 = arith.extui %10 : i1 to i32
    %c0_i32_9 = arith.constant 0 : i32
    %12 = arith.cmpi ne, %11, %c0_i32_9 : i32
    scf.if %12 {
      %c0_10 = arith.constant 0 : index
      %c0_11 = arith.constant 0 : index
      %13 = vector.load %arg5[%c0_10, %c0_11] : memref<8x32xf32, #tpu.memory_space<vmem>>, vector<8x32xf32>
      %cst = arith.constant dense<0.000000e+00> : vector<32xf32>
      %14 = vector.multi_reduction <add>, %13, %cst [0] : vector<8x32xf32> to vector<32xf32>
      %15 = vector.shape_cast %14 : vector<32xf32> to vector<1x32xf32>
      %c0_12 = arith.constant 0 : index
      %c0_13 = arith.constant 0 : index
      %16 = vector.load %arg4[%c0_12, %c0_13] : memref<1x32xf32, #tpu.memory_space<vmem>>, vector<1x32xf32>
      tpu.vector_store %arg4[%c0_12, %c0_13], %15 {strides = array<i32>} : memref<1x32xf32, #tpu.memory_space<vmem>>, vector<1x32xf32>,
    } else {
    }
    return
  }
  func.func @transform_0(%arg0: i32, %arg1: i32) -> (i32, i32) {
    %c0_i32 = arith.constant 0 : i32
    return %arg1, %arg0 : i32, i32
  }
  func.func @transform_1(%arg0: i32, %arg1: i32) -> (i32, i32) {
    %c0_i32 = arith.constant 0 : i32
    return %arg1, %arg0 : i32, i32
  }
  func.func @transform_2(%arg0: i32, %arg1: i32) -> (i32, i32) {
    %c0_i32 = arith.constant 0 : i32
    %c0_i32_0 = arith.constant 0 : i32
    return %c0_i32, %arg0 : i32, i32
  }
}

</mosaic_0001>

<bundles_post_ra>
// kernel: tpu_custom_call.1
= control target key start
LH: loop header
LB: loop body
LE: loop exit
PB: predicated region body
PF: predicated region fallthrough
CT: control target
= control target key end

     0   :  { %7 = vsyncpa [#allocation4], 0  ;;  %s177_s0 = inlined_call_operand.hbm [shape: f32[8,32], index: 0, kind: input, shape index: {}]   ;;  %s178_s1 = inlined_call_operand.hbm [shape: f32[8,32], index: 1, kind: input, shape index: {}]   ;;  %s179_s2 = inlined_call_operand.hbm [shape: f32[1,32], index: 2, kind: output, shape index: {}]  }
   0x1   :  { %8 = vsyncpa [#allocation7], 0 }
   0x2   :  { %9 = vsyncpa [#allocation5], 0  ;;  %s149_s9 = smov [#allocation3]   ;;  %s150_s11 = smov [#allocation6]  }
   0x3   :  { %s16_s10 = sshll.u32 %s149_s9, 4  ;;  %s26_s12 = sshll.u32 %s150_s11, 4  ;;  %s17_s10 = int_to_ptr.vmem [resolvable:$true] %s16_s10  ;;  %s27_s12 = int_to_ptr.vmem [resolvable:$true] %s26_s12 }
   0x4   :  { %s91_s13 = scalar_lea.vmem %s17_s10, 128  ;;  %p96_p1 = scmp.lt.s32.totalorder %s17_s10, %s17_s10 }
   0x5   :  { %p92_p0 = scmp.ne.s32.totalorder %s17_s10, %s91_s13  ;;  %p97_p2 = scmp.lt.s32.totalorder %s91_s13, %s91_s13 }
   0x7   :  { %p98_p3 = por %p97_p2, %p96_p1 }
   0x9   :  { %p99_p4 = pnand %p98_p3, %p92_p0 }
   0xb   :  { %102 = shalt.err (!%p99_p4)
}
   0xc   :  { %19 = dma.hbm_to_vmem [thread:$0]  %s177_s0, 128, %s17_s10, [#allocation4]  }
   0xd   :  { %s111_s16 = scalar_lea.vmem %s27_s12, 128  ;;  %p116_p6 = scmp.lt.s32.totalorder %s27_s12, %s27_s12 }
   0xe   :  { %p112_p5 = scmp.ne.s32.totalorder %s27_s12, %s111_s16  ;;  %p117_p7 = scmp.lt.s32.totalorder %s111_s16, %s111_s16 }
  0x10   :  { %p118_p8 = por %p117_p7, %p116_p6 }
  0x12   :  { %p119_p9 = pnand %p118_p8, %p112_p5 }
  0x14   :  { %122 = shalt.err (!%p119_p9)
}
  0x15   :  { %29 = dma.hbm_to_vmem [thread:$0]  %s178_s1, 128, %s27_s12, [#allocation7]  }
  0x16   :  { %143 = dma.done.wait [#allocation4], 128  }
  0x17   :  { %144 = vsyncadd [#allocation4], 4294967168 }
  0x18   :  { %145 = dma.done.wait [#allocation7], 128  }
  0x19   :  { %146 = vsyncadd [#allocation7], 4294967168  ;;  %vm40_vm0 = vcmask 261120   ;;  %v151_v0 = vmov 0.0   ;;  %v42_v1 = vld [vmem:[#allocation3] sm:$0xff]  ;;  %v43_v2 = vld [vmem:[#allocation6] sm:$0xff] }
  0x1a   :  { %41 = vst.msk [vmem:[#allocation2] sm:$0xff] %vm40_vm0, %v151_v0  ;;  %v44_v3 = vsub.f32 %v42_v1, %v43_v2  ;;  %s152_s0 = smov [#allocation8]   ;;  %vm61_vm1 = vcmask 253952  }
  0x1b   :  { %s69_s1 = sshll.u32 %s152_s0, 4  ;;  %s70_s1 = int_to_ptr.vmem [resolvable:$true] %s69_s1 }
  0x1c   :  { %v45_v5 = vmul.f32 %v44_v3, %v44_v3  ;;  %s123_s19 = scalar_lea.vmem %s70_s1, 16  ;;  %s127_s20 = scalar_lea.vmem %s70_s1, 32 }
  0x1d   :  { %p124_p10 = scmp.ne.s32.totalorder %s70_s1, %s123_s19  ;;  %p128_p11 = scmp.lt.s32.totalorder %s70_s1, %s70_s1 }
  0x1e   :  { %p129_p12 = scmp.lt.s32.totalorder %s127_s20, %s123_s19 }
  0x20   :  { %p130_p13 = por %p129_p12, %p128_p11 }
  0x21   :  { %v46_v4 = vld [vmem:[#allocation2] sm:$0xff] }
  0x22   :  { %v47_v6 = vadd.f32 %v46_v4, %v45_v5  ;;  %p131_p0 = pnand %p130_p13, %p124_p10 }
  0x24   :  { %49 = vst.msk [vmem:[#allocation2] sm:$0xff] %vm40_vm0, %v47_v6 }
  0x2b   :  { %v53_v7 = vld [vmem:[#allocation2] sm:$0xff] }
  0x2c   :  { %v54_v8 = vsel %vm40_vm0, %v53_v7, 0.0 }
  0x2d   :  { %v55_v9 = vrot.slane %v54_v8, 4 }
  0x2f   :  { %v56_v10 = vadd.f32 %v55_v9, %v54_v8 }
  0x31   :  { %v57_v11 = vrot.slane %v56_v10, 2 }
  0x33   :  { %v58_v12 = vadd.f32 %v57_v11, %v56_v10 }
  0x35   :  { %v59_v13 = vrot.slane %v58_v12, 1 }
  0x37   :  { %v60_v14 = vadd.f32 %v59_v13, %v58_v12 }
  0x39   :  { %62 = vst.msk [vmem:[#allocation8] sm:$0x1] %vm61_vm1, %v60_v14 }
  0x3a   :  { %134 = shalt.err (!%p131_p0)
}
  0x3b   :  { %72 = dma.vmem_to_hbm [thread:$0]  %s70_s1, 16, %s179_s2, [#allocation5]  }
  0x3c   :  { %147 = dma.done.wait [#allocation5], 16  }
  0x3d   :  { %148 = vsyncadd [#allocation5], 4294967280 }
  0x3e   :  { %76 = vsyncpa [#allocation4], 1 }
  0x3f   :  { %77 = vsyncpa [#allocation7], 1 }
  0x40   :  { %78 = vsyncpa [#allocation5], 1 }

</bundles_post_ra>
